<compile_context>
chip_gen: v7x
topology: tpu7x:2x2x1
jax: 0.10.0
libtpu: 0.0.40
codegen_flags: <defaults>
</compile_context>

<pallas_src>
import jax
import jax.numpy as jnp
from jax.experimental import pallas as pl
from jax.experimental.pallas import tpu as pltpu


NEG_SLOPE = 0.01  # nn.LeakyReLU default negative_slope


def attention_softmax_kernel(x_ref, w1_ref, b1_ref, wqt_ref, bq_ref,
                             res_ref, attn_ref):
    # x_ref   : (TB, N, F)   TB bags per grid step
    # w1_ref  : (F, Fo)      pre-transposed Linear(in, out) weight
    # b1_ref  : (1, Fo)
    # wqt_ref : (Fo, 1)      pre-transposed query Linear weight
    # bq_ref  : (1, 1)
    # res_ref : (TB, 1, F)
    # attn_ref: (TB, N, 1)
    tb, n, f = x_ref.shape

    x = x_ref[...].astype(jnp.float32)                 # (TB, N, F)
    w1 = w1_ref[...].astype(jnp.float32)               # (F, Fo)
    b1 = b1_ref[...].astype(jnp.float32)               # (1, Fo)
    wqt = wqt_ref[...].astype(jnp.float32)             # (Fo, 1)
    bq = bq_ref[...].astype(jnp.float32)               # (1, 1)

    # Flatten bags+instances so both projections are single MXU matmuls.
    x2 = x.reshape(tb * n, f)                          # (TB*N, F)

    # keys = LeakyReLU(x @ W_tr^T + b_tr)   -> MXU + VPU
    keys = jnp.dot(x2, w1, preferred_element_type=jnp.float32) + b1   # (TB*N, Fo)
    keys = jnp.where(keys > 0, keys, NEG_SLOPE * keys)

    # attention logits: (TB*N, 1) -> (TB, N, 1)        -> MXU
    scores = jnp.dot(keys, wqt, preferred_element_type=jnp.float32) + bq
    scores = scores.reshape(tb, n, 1)

    # numerically-stable softmax over the instance axis (per bag)
    m = jnp.max(scores, axis=1, keepdims=True)         # (TB, 1, 1)
    e = jnp.exp(scores - m)                            # (TB, N, 1)
    s = jnp.sum(e, axis=1, keepdims=True)              # (TB, 1, 1)
    attn = e * pl.reciprocal(s, approx=False)          # (TB, N, 1)

    # weighted sum of instances: (TB, 1, F)
    res = jnp.sum(attn * x, axis=1, keepdims=True)

    res_ref[...] = res.astype(res_ref.dtype)
    attn_ref[...] = attn.astype(attn_ref.dtype)


def _pick_bags_per_block(B, N, F, itemsize):
    """Largest divisor of B whose x-block stays small, to amortize grid overhead."""
    if N % 8 != 0:
        return 1  # keep the in-kernel (TB*N, F) reshape relayout-free
    budget = 2 * 1024 * 1024  # ~2 MiB per x block (double-buffered by Pallas)
    tb = max(1, min(B, budget // max(1, N * F * itemsize)))
    while B % tb != 0:
        tb -= 1
    return tb


def attention_softmax(x, w_tr, b_tr, w_q, b_q):
    """Forward pass of AttentionSoftMax.

    x    : (N, F) (module default, otherdim='') or (B, N, F) batched bags
    w_tr : (Fo, F)  torch Linear weight layout
    b_tr : (Fo,)
    w_q  : (1, Fo)
    b_q  : (1,)
    Returns (result, attention_map) with shapes ((F,), (N,)) or ((B,F), (B,N)).
    """
    squeeze_batch = (x.ndim == 2)
    xb = x[None] if squeeze_batch else x
    B, N, F = xb.shape
    Fo = w_tr.shape[0]

    w1 = jnp.transpose(w_tr)            # (F, Fo)
    b1 = b_tr.reshape(1, Fo)
    wqt = jnp.transpose(w_q.reshape(1, Fo))  # (Fo, 1)
    bq = b_q.reshape(1, 1)

    TB = _pick_bags_per_block(B, N, F, jnp.dtype(xb.dtype).itemsize)

    res, attn = pl.pallas_call(
        attention_softmax_kernel,
        out_shape=(
            jax.ShapeDtypeStruct((B, 1, F), x.dtype),
            jax.ShapeDtypeStruct((B, N, 1), x.dtype),
        ),
        grid=(B // TB,),
        in_specs=[
            pl.BlockSpec((TB, N, F), lambda b: (b, 0, 0)),   # x: TB bags per step
            pl.BlockSpec((F, Fo), lambda b: (0, 0)),         # W_tr^T
            pl.BlockSpec((1, Fo), lambda b: (0, 0)),         # b_tr
            pl.BlockSpec((Fo, 1), lambda b: (0, 0)),         # W_q^T
            pl.BlockSpec((1, 1), lambda b: (0, 0)),          # b_q
        ],
        out_specs=(
            pl.BlockSpec((TB, 1, F), lambda b: (b, 0, 0)),   # result
            pl.BlockSpec((TB, N, 1), lambda b: (b, 0, 0)),   # attention map
        ),
        compiler_params=pltpu.CompilerParams(
            dimension_semantics=("parallel",),
        ),
    )(xb, w1, b1, wqt, bq)

    res = res[:, 0, :]        # (B, F)
    attn = attn[:, :, 0]      # (B, N)
    if squeeze_batch:
        return res[0], attn[0]
    return res, attn


def attention_softmax_ref(x, w_tr, b_tr, w_q, b_q):
    keys = x @ w_tr.T + b_tr
    keys = jnp.where(keys > 0, keys, NEG_SLOPE * keys)
    raw = (keys @ w_q.T + b_q)[..., 0]
    attn = jax.nn.softmax(raw, axis=-1)
    result = jnp.einsum('...i,...ij->...j', attn, x)
    return result, attn


if __name__ == "__main__":
    key = jax.random.PRNGKey(0)
    k1, k2, k3, k4, k5, k6 = jax.random.split(key, 6)

    N, F = 8, 32        # seq=8 instances per bag, hidden=32 = in_features
    Fo = F              # out_features defaults to in_features
    B = 2               # batch of bags for the batched path

    # Deterministic parameters (torch Linear layout: weight (out, in), bias (out,))
    w_tr = jax.random.normal(k1, (Fo, F), jnp.float32) * 0.1
    b_tr = jax.random.normal(k2, (Fo,), jnp.float32) * 0.1
    w_q = jax.random.normal(k3, (1, Fo), jnp.float32) * 0.1
    b_q = jax.random.normal(k4, (1,), jnp.float32) * 0.1

    # 1) 2-D input: the module's default (otherdim='') semantics.
    x2d = jax.random.normal(k5, (N, F), jnp.float32)
    res2d, attn2d = attention_softmax(x2d, w_tr, b_tr, w_q, b_q)
    res2d = jax.block_until_ready(res2d)
    r_ref, a_ref = attention_softmax_ref(x2d, w_tr, b_tr, w_q, b_q)
    assert res2d.shape == (F,) and attn2d.shape == (N,)
    assert jnp.allclose(res2d, r_ref, atol=1e-5, rtol=1e-5)
    assert jnp.allclose(attn2d, a_ref, atol=1e-5, rtol=1e-5)

    # 2) Batched bags (multiple bags fused per grid step; same per-bag semantics).
    xb = jax.random.normal(k6, (B, N, F), jnp.float32)
    resb, attnb = attention_softmax(xb, w_tr, b_tr, w_q, b_q)
    resb = jax.block_until_ready(resb)
    rb_ref, ab_ref = attention_softmax_ref(xb, w_tr, b_tr, w_q, b_q)
    assert resb.shape == (B, F) and attnb.shape == (B, N)
    assert jnp.allclose(resb, rb_ref, atol=1e-5, rtol=1e-5)
    assert jnp.allclose(attnb, ab_ref, atol=1e-5, rtol=1e-5)

    print("KERNEL_OK")
</pallas_src>

<mosaic_0001>
module attributes {stable_mosaic.version = 11 : i64} {
  func.func @attention_softmax_kernel(%arg0: i32, %arg1: memref<1x8x32xf32, #tpu.memory_space<vmem>>, %arg2: memref<32x32xf32, #tpu.memory_space<vmem>>, %arg3: memref<1x32xf32, #tpu.memory_space<vmem>>, %arg4: memref<32x1xf32, #tpu.memory_space<vmem>>, %arg5: memref<1x1xf32, #tpu.memory_space<vmem>>, %arg6: memref<1x1x32xf32, #tpu.memory_space<vmem>>, %arg7: memref<1x8x1xf32, #tpu.memory_space<vmem>>) attributes {dimension_semantics = [#tpu.dimension_semantics<parallel>], iteration_bounds = array<i64: 1>, scalar_prefetch = 0 : i64, scratch_operands = 0 : i64, tpu.core_type = #tpu.core_type<tc>, window_params = [{transform_indices = @transform_0, window_bounds = array<i64: 1, 8, 32>}, {pipeline_mode = #tpu.pipeline_mode<synchronous>, transform_indices = @transform_1, window_bounds = array<i64: 32, 32>}, {pipeline_mode = #tpu.pipeline_mode<synchronous>, transform_indices = @transform_2, window_bounds = array<i64: 1, 32>}, {pipeline_mode = #tpu.pipeline_mode<synchronous>, transform_indices = @transform_3, window_bounds = array<i64: 32, 1>}, {pipeline_mode = #tpu.pipeline_mode<synchronous>, transform_indices = @transform_4, window_bounds = array<i64: 1, 1>}, {transform_indices = @transform_5, window_bounds = array<i64: 1, 1, 32>}, {transform_indices = @transform_6, window_bounds = array<i64: 1, 8, 1>}]} {
    %c0 = arith.constant 0 : index
    %c0_0 = arith.constant 0 : index
    %c0_1 = arith.constant 0 : index
    %0 = vector.load %arg1[%c0, %c0_0, %c0_1] : memref<1x8x32xf32, #tpu.memory_space<vmem>>, vector<1x8x32xf32>
    %c0_2 = arith.constant 0 : index
    %c0_3 = arith.constant 0 : index
    %1 = vector.load %arg2[%c0_2, %c0_3] : memref<32x32xf32, #tpu.memory_space<vmem>>, vector<32x32xf32>
    %c0_4 = arith.constant 0 : index
    %c0_5 = arith.constant 0 : index
    %2 = vector.load %arg3[%c0_4, %c0_5] : memref<1x32xf32, #tpu.memory_space<vmem>>, vector<1x32xf32>
    %c0_6 = arith.constant 0 : index
    %c0_7 = arith.constant 0 : index
    %3 = vector.load %arg4[%c0_6, %c0_7] : memref<32x1xf32, #tpu.memory_space<vmem>>, vector<32x1xf32>
    %c0_8 = arith.constant 0 : index
    %c0_9 = arith.constant 0 : index
    %4 = vector.load %arg5[%c0_8, %c0_9] : memref<1x1xf32, #tpu.memory_space<vmem>>, vector<1x1xf32>
    %5 = vector.shape_cast %0 : vector<1x8x32xf32> to vector<8x32xf32>
    %cst = arith.constant dense<0.000000e+00> : vector<8x32xf32>
    %6 = tpu.matmul %5, %1, %cst {dimension_numbers = #tpu.dot_dimension_numbers<[1], [0], [0], [1], [0, 0, 1, 1], [], []>} : vector<8x32xf32>, vector<32x32xf32>, vector<8x32xf32> -> vector<8x32xf32>
    %7 = vector.broadcast %2 : vector<1x32xf32> to vector<8x32xf32>
    %8 = arith.addf %6, %7 : vector<8x32xf32>
    %cst_10 = arith.constant 0.000000e+00 : f32
    %9 = vector.broadcast %cst_10 : f32 to vector<8x32xf32>
    %10 = arith.cmpf ogt, %8, %9 : vector<8x32xf32>
    %cst_11 = arith.constant 0.00999999977 : f32
    %11 = vector.broadcast %cst_11 : f32 to vector<8x32xf32>
    %12 = arith.mulf %11, %8 : vector<8x32xf32>
    %13 = arith.select %10, %8, %12 : vector<8x32xi1>, vector<8x32xf32>
    %cst_12 = arith.constant dense<0.000000e+00> : vector<8x1xf32>
    %14 = tpu.matmul %13, %3, %cst_12 {dimension_numbers = #tpu.dot_dimension_numbers<[1], [0], [0], [1], [0, 0, 1, 1], [], []>} : vector<8x32xf32>, vector<32x1xf32>, vector<8x1xf32> -> vector<8x1xf32>
    %15 = vector.broadcast %4 : vector<1x1xf32> to vector<8x1xf32>
    %16 = arith.addf %14, %15 : vector<8x1xf32>
    %17 = vector.shape_cast %16 : vector<8x1xf32> to vector<1x8x1xf32>
    %cst_13 = arith.constant dense<0xFF800000> : vector<1x1xf32>
    %18 = vector.multi_reduction <maximumf>, %17, %cst_13 [1] : vector<1x8x1xf32> to vector<1x1xf32>
    %19 = vector.shape_cast %18 : vector<1x1xf32> to vector<1x1x1xf32>
    %20 = vector.broadcast %19 : vector<1x1x1xf32> to vector<1x8x1xf32>
    %21 = arith.subf %17, %20 : vector<1x8x1xf32>
    %22 = math.exp %21 : vector<1x8x1xf32>
    %cst_14 = arith.constant dense<0.000000e+00> : vector<1x1xf32>
    %23 = vector.multi_reduction <add>, %22, %cst_14 [1] : vector<1x8x1xf32> to vector<1x1xf32>
    %24 = vector.shape_cast %23 : vector<1x1xf32> to vector<1x1x1xf32>
    %25 = tpu.reciprocal %24 : vector<1x1x1xf32> -> vector<1x1x1xf32>
    %26 = vector.broadcast %25 : vector<1x1x1xf32> to vector<1x8x1xf32>
    %27 = arith.mulf %22, %26 : vector<1x8x1xf32>
    %28 = vector.broadcast %27 : vector<1x8x1xf32> to vector<1x8x32xf32>
    %29 = arith.mulf %28, %0 : vector<1x8x32xf32>
    %cst_15 = arith.constant dense<0.000000e+00> : vector<1x32xf32>
    %30 = vector.multi_reduction <add>, %29, %cst_15 [1] : vector<1x8x32xf32> to vector<1x32xf32>
    %31 = vector.shape_cast %30 : vector<1x32xf32> to vector<1x1x32xf32>
    %c0_16 = arith.constant 0 : index
    %c0_17 = arith.constant 0 : index
    %c0_18 = arith.constant 0 : index
    %32 = vector.load %arg6[%c0_16, %c0_17, %c0_18] : memref<1x1x32xf32, #tpu.memory_space<vmem>>, vector<1x1x32xf32>
    tpu.vector_store %arg6[%c0_16, %c0_17, %c0_18], %31 {strides = array<i32>} : memref<1x1x32xf32, #tpu.memory_space<vmem>>, vector<1x1x32xf32>,
    %c0_19 = arith.constant 0 : index
    %c0_20 = arith.constant 0 : index
    %c0_21 = arith.constant 0 : index
    %33 = vector.load %arg7[%c0_19, %c0_20, %c0_21] : memref<1x8x1xf32, #tpu.memory_space<vmem>>, vector<1x8x1xf32>
    tpu.vector_store %arg7[%c0_19, %c0_20, %c0_21], %27 {strides = array<i32>} : memref<1x8x1xf32, #tpu.memory_space<vmem>>, vector<1x8x1xf32>,
    return
  }
  func.func @transform_0(%arg0: i32) -> (i32, i32, i32) {
    %c0_i32 = arith.constant 0 : i32
    %c0_i32_0 = arith.constant 0 : i32
    %c0_i32_1 = arith.constant 0 : i32
    return %arg0, %c0_i32, %c0_i32_0 : i32, i32, i32
  }
  func.func @transform_1(%arg0: i32) -> (i32, i32) {
    %c0_i32 = arith.constant 0 : i32
    %c0_i32_0 = arith.constant 0 : i32
    %c0_i32_1 = arith.constant 0 : i32
    return %c0_i32, %c0_i32_0 : i32, i32
  }
  func.func @transform_2(%arg0: i32) -> (i32, i32) {
    %c0_i32 = arith.constant 0 : i32
    %c0_i32_0 = arith.constant 0 : i32
    %c0_i32_1 = arith.constant 0 : i32
    return %c0_i32, %c0_i32_0 : i32, i32
  }
  func.func @transform_3(%arg0: i32) -> (i32, i32) {
    %c0_i32 = arith.constant 0 : i32
    %c0_i32_0 = arith.constant 0 : i32
    %c0_i32_1 = arith.constant 0 : i32
    return %c0_i32, %c0_i32_0 : i32, i32
  }
  func.func @transform_4(%arg0: i32) -> (i32, i32) {
    %c0_i32 = arith.constant 0 : i32
    %c0_i32_0 = arith.constant 0 : i32
    %c0_i32_1 = arith.constant 0 : i32
    return %c0_i32, %c0_i32_0 : i32, i32
  }
  func.func @transform_5(%arg0: i32) -> (i32, i32, i32) {
    %c0_i32 = arith.constant 0 : i32
    %c0_i32_0 = arith.constant 0 : i32
    %c0_i32_1 = arith.constant 0 : i32
    return %arg0, %c0_i32, %c0_i32_0 : i32, i32, i32
  }
  func.func @transform_6(%arg0: i32) -> (i32, i32, i32) {
    %c0_i32 = arith.constant 0 : i32
    %c0_i32_0 = arith.constant 0 : i32
    %c0_i32_1 = arith.constant 0 : i32
    return %arg0, %c0_i32, %c0_i32_0 : i32, i32, i32
  }
}

</mosaic_0001>

<bundles_post_ra>
// kernel: tpu_custom_call.1
= control target key start
LH: loop header
LB: loop body
LE: loop exit
PB: predicated region body
PF: predicated region fallthrough
CT: control target
= control target key end

     0   :  { %s428_s0 = inlined_call_operand.vmem [shape: f32[1,8,32], index: 0, kind: input, shape index: {}]   ;;  %s429_s1 = inlined_call_operand.vmem [shape: f32[32,32], index: 1, kind: input, shape index: {}]   ;;  %s430_s2 = inlined_call_operand.vmem [shape: f32[1,32], index: 2, kind: input, shape index: {}]   ;;  %s431_s3 = inlined_call_operand.vmem [shape: f32[32,1], index: 3, kind: input, shape index: {}]   ;;  %s432_s4 = inlined_call_operand.<no memory space> [shape: f32[1,1], index: 4, kind: input, shape index: {}]   ;;  %s433_s5 = inlined_call_operand.hbm [shape: f32[1,1,32], index: 5, kind: output, shape index: {0}]   ;;  %s434_s6 = inlined_call_operand.vmem [shape: f32[1,8,1], index: 6, kind: output, shape index: {1}]  }
   0x1   :  { %v12_v0 = vstv %s432_s4 }
   0x2   :  { %13 = vst [vmem:[#allocation2] sm:$0x1] %v12_v0 }
   0x3   :  { %v26_v1 = vld [vmem:[%s429_s1] sm:$0xff]  ;;  %v27_v2 = vld [vmem:[%s429_s1 + $0x8] sm:$0xff]  ;;  %v28_v3 = vld [vmem:[%s429_s1 + $0x10] sm:$0xff]  ;;  %v334_v4 = vmov 0.0|0.0   ;;  %vm335_vm0 = vmmov 0   ;;  %v336_v7 = vmov 0.0  }
   0x4   :  { %288 = vmatprep.subr.bf16.mxu0 %v334_v4  ;;  %v289_v5 = vpack.c.bf16 %v27_v2, %v26_v1  ;;  %v29_v6 = vld [vmem:[%s429_s1 + $0x18] sm:$0xff]  ;;  %274 = vmatprep.mubr.msk.f32.mxu0 %vm335_vm0, %v336_v7  ;;  %v31_v8 = vld [vmem:[%s431_s3] sm:$0xff]  ;;  %v32_v9 = vld [vmem:[%s431_s3 + $0x8] sm:$0xff] }
   0x5   :  { %294 = vmatprep.subr.bf16.mxu1 %v334_v4  ;;  %285 = vmatprep.mubr.msk.f32.mxu1 %vm335_vm0, %v336_v7 }
   0x6   :  { %14 = vsyncpa [#allocation4], 0  ;;  %290 = vmatpush3.bf16.msra.mxu0 %v289_v5  ;;  %v292_v10 = vpack.c.bf16 %v29_v6, %v28_v3  ;;  %v295_v11 = vpack.c.bf16 %v32_v9, %v31_v8  ;;  %v25_v12 = vld [vmem:[%s428_s0] sm:$0xff]  ;;  %vm42_vm1 = vcmask 261120   ;;  %v33_v13 = vld [vmem:[%s431_s3 + $0x10] sm:$0xff]  ;;  %v337_v22 = vmov 0  }
   0x7   :  { %291 = vmatprep.subr.bf16.mxu0 %v334_v4  ;;  %v34_v14 = vld [vmem:[%s431_s3 + $0x18] sm:$0xff]  ;;  %v252_v16 = vld [vmem:[%s430_s2] ss:$0 sm:$0xff]  ;;  %305 = vset.pattern.permute.xlu0 %v337_v22  ;;  %vm198_vm3 = vcmask 7168   ;;  %s338_s3 = smov [#allocation3]   ;;  %vm231_vm4 = vcmask 253952  }
   0x8   :  { %296 = vmatpush3.bf16.msra.mxu1 %v295_v11  ;;  %v298_v15 = vpack.c.bf16 %v34_v14, %v33_v13  ;;  %s240_s17 = sshll.u32 %s338_s3, 4  ;;  %s241_s17 = int_to_ptr.vmem [resolvable:$true] %s240_s17 }
   0x9   :  { %297 = vmatprep.subr.bf16.mxu1 %v334_v4  ;;  %v254_v23 = vld [vmem:[#allocation2] ss:$0 sm:$0xff]  ;;  %s310_s18 = scalar_lea.vmem %s241_s17, 16  ;;  %s314_s19 = scalar_lea.vmem %s241_s17, 32 }
   0xa   :  { %293 = vmatpush3.bf16.msra.mxu0 %v292_v10  ;;  %p311_p0 = scmp.ne.s32.totalorder %s241_s17, %s310_s18  ;;  %p315_p1 = scmp.lt.s32.totalorder %s241_s17, %s241_s17 }
   0xb   :  { %p316_p2 = scmp.lt.s32.totalorder %s314_s19, %s310_s18 }
   0xc   :  { %299 = vmatpush3.bf16.msra.mxu1 %v298_v15 }
   0xd   :  { %275 = vmatmul.mubr.msk.f32.vlgmr.msra.gmra.mrb[0].mxu0 %vm42_vm1, %v25_v12  ;;  %p317_p3 = por %p316_p2, %p315_p1 }
   0xf   :  { %p318_p4 = pnand %p317_p3, %p311_p0 }
  0xe0   :  { %v112_v17 = vpop.f32.mrb[0].mxu0 }
  0xe1   :  { %v113_v18 = vadd.f32 %v252_v16, %v112_v17  ;;  %v276_v19 = vpop.f32.mrb[1].mxu0 }
  0xe3   :  { %vm116_vm2 = vcmp.gt.f32.partialorder %v113_v18, 0.0  ;;  %v117_v20 = vmul.f32 0.01, %v113_v18 }
  0xe5   :  { %v118_v21 = vsel %vm116_vm2, %v113_v18, %v117_v20 }
  0xe6   :  { %286 = vmatmul.mubr.msk.f32.vlgmr.msra.gmra.mrb[0].mxu1 %vm42_vm1, %v118_v21 }
 0x1b9   :  { %v194_v24 = vpop.f32.mrb[0].mxu1 }
 0x1ba   :  { %v195_v25 = vadd.f32 %v254_v23, %v194_v24  ;;  %v287_v26 = vpop.f32.mrb[1].mxu1 }
 0x1bc   :  { %v199_v27 = vsel %vm198_vm3, %v195_v25, -inf }
 0x1bd   :  { %v200_v28 = vrot.slane %v199_v27, 4 }
 0x1bf   :  { %v201_v29 = vmax.f32 %v199_v27, %v200_v28 }
 0x1c1   :  { %v202_v30 = vrot.slane %v201_v29, 2 }
 0x1c3   :  { %v203_v31 = vmax.f32 %v201_v29, %v202_v30 }
 0x1c5   :  { %v204_v32 = vrot.slane %v203_v31, 1 }
 0x1c7   :  { %v205_v33 = vmax.f32 %v203_v31, %v204_v32 }
 0x1c9   :  { %v206_v34 = vsub.f32 %v195_v25, %v205_v33 }
 0x1cb   :  { %v207_v35 = vmul.f32 1.442695, %v206_v34 }
 0x1cd   :  { %306 = vpow2.f32 %v207_v35 }
 0x1d7   :  { %v307_v36 = vpop.eup %306 }
 0x1d8   :  { %v209_v37 = vsel %vm198_vm3, %v307_v36, 0.0 }
 0x1d9   :  { %v210_v38 = vrot.slane %v209_v37, 4 }
 0x1db   :  { %v211_v39 = vadd.f32 %v210_v38, %v209_v37 }
 0x1dd   :  { %v212_v40 = vrot.slane %v211_v39, 2 }
 0x1df   :  { %v213_v41 = vadd.f32 %v212_v40, %v211_v39 }
 0x1e1   :  { %v214_v42 = vrot.slane %v213_v41, 1 }
 0x1e3   :  { %v215_v43 = vadd.f32 %v214_v42, %v213_v41 }
 0x1e5   :  { %308 = vrcp.f32 %v215_v43 }
 0x1ef   :  { %v309_v44 = vpop.eup %308 }
 0x1f0   :  { %v217_v45 = vmul.f32 %v309_v44, %v307_v36 }
 0x1f2   :  { %220 = vperm.xlu0 %305, %v217_v45   ;;  %233 = vst.msk [vmem:[%s434_s6] sm:$0xff] %vm198_vm3, %v217_v45 }
 0x271   :  { %v221_v46 = vpop.permute.xlu0 %220 }
 0x272   :  { %v223_v47 = vmul.f32 %v221_v46, %v25_v12 }
 0x274   :  { %v224_v48 = vsel %vm42_vm1, %v223_v47, 0.0 }
 0x275   :  { %v225_v49 = vrot.slane %v224_v48, 4 }
 0x277   :  { %v226_v50 = vadd.f32 %v225_v49, %v224_v48 }
 0x279   :  { %v227_v51 = vrot.slane %v226_v50, 2 }
 0x27b   :  { %v228_v52 = vadd.f32 %v227_v51, %v226_v50 }
 0x27d   :  { %v229_v53 = vrot.slane %v228_v52, 1 }
 0x27f   :  { %v230_v54 = vadd.f32 %v229_v53, %v228_v52 }
 0x281   :  { %232 = vst.msk [vmem:[#allocation3] sm:$0x1] %vm231_vm4, %v230_v54 }
 0x282   :  { %321 = shalt.err (!%p318_p4)
}
 0x283   :  { %s322_s21 = scalar_lea.hbm %s433_s5, 16 }
 0x284   :  { %p323_p5 = scmp.ne.s32.totalorder %s433_s5, %s322_s21  ;;  %p326_p6 = scmp.lt.u32.totalorder %s322_s21, %s433_s5 }
 0x286   :  { %p328_p7 = pnand %p326_p6, %p323_p5 }
 0x288   :  { %331 = shalt.err (!%p328_p7)
}
 0x289   :  { %243 = dma.vmem_to_hbm [thread:$0]  %s241_s17, 16, %s433_s5, [#allocation4]  }
 0x28a   :  { %332 = dma.done.wait [#allocation4], 16  }
 0x28b   :  { %333 = vsyncadd [#allocation4], 4294967280 }
 0x28c   :  { %251 = vsyncpa [#allocation4], 1 }

</bundles_post_ra>
